<compile_context>
chip_gen: v6e
topology: v6e:2x2x1
jax: 0.10.0
libtpu: 0.0.40
codegen_flags: <defaults>
</compile_context>

<pallas_src>
import numpy as np
import jax
import jax.numpy as jnp
from jax.experimental import pallas as pl
from jax.experimental.pallas import tpu as pltpu


def build_grid(resolution):
    """Standard slot-attention grid: (1, H, W, 4) with [y, x, 1-y, 1-x] coords."""
    ranges = [np.linspace(0.0, 1.0, num=res) for res in resolution]
    g = np.meshgrid(*ranges, sparse=False, indexing="ij")
    g = np.stack(g, axis=-1).reshape(resolution[0], resolution[1], -1)
    g = np.expand_dims(g, axis=0).astype(np.float32)
    return np.concatenate([g, 1.0 - g], axis=-1)


# --------------------------------------------------------------------------- #
# Kernels
# --------------------------------------------------------------------------- #
def _compute_pos_f32(grid_ref, w_ref, b_ref):
    """pos = bias + sum_f W[:, f] * grid[f, :]  as 4 unrolled VPU broadcast FMAs."""
    pos = b_ref[...] + w_ref[:, 0:1] * grid_ref[0:1, :]          # (C,1)*(1,HWT)
    for f in range(1, 4):
        pos = pos + w_ref[:, f:f + 1] * grid_ref[f:f + 1, :]
    return pos                                                    # (C, HWT) f32


def _pos_add_hoisted_kernel(grid_ref, w_ref, b_ref, x_ref, o_ref, pos_ref):
    """grid=(n_hw, B): compute pos once per HW tile (b==0), pure add afterwards."""
    @pl.when(pl.program_id(1) == 0)
    def _():
        pos_ref[...] = _compute_pos_f32(grid_ref, w_ref, b_ref).astype(pos_ref.dtype)

    o_ref[...] = x_ref[...] + pos_ref[...]                        # same-dtype add


def _pos_add_simple_kernel(grid_ref, w_ref, b_ref, x_ref, o_ref):
    """grid=(B,): recompute pos per step (cheap VPU filler), B stays parallel."""
    pos = _compute_pos_f32(grid_ref, w_ref, b_ref)
    o_ref[...] = x_ref[...] + pos.astype(o_ref.dtype)


# --------------------------------------------------------------------------- #
# Tiling / VMEM helpers
# --------------------------------------------------------------------------- #
def _vmem_capacity_bytes():
    try:
        info = pltpu.get_tpu_info()
        cap = getattr(info, "vmem_capacity_bytes", None)
        if cap:
            return int(cap)
    except Exception:
        pass
    return 64 << 20  # conservative fallback (v7x per-TC VMEM)


def _choose_hw_tile(hw_pad, C, itemsize, budget_bytes):
    """Largest lane-dense tile of hw_pad (multiple of 128, divides hw_pad) within budget.

    128 lanes is the hard floor (lane width); if C*128*itemsize exceeds the
    budget we still return 128 and the caller sizes vmem_limit_bytes from the
    actual tile, so the scoped limit is never silently exceeded.
    """
    max_lanes = max(128, (budget_bytes // max(1, C * itemsize)) // 128 * 128)
    if hw_pad <= max_lanes:
        return hw_pad
    best = 128
    t = 128
    while t <= min(hw_pad, max_lanes):
        if hw_pad % t == 0:
            best = t
        t += 128
    return best


def _estimate_vmem_footprint(C, hw_tile, itemsize, hoisted):
    blk = C * hw_tile * itemsize
    fp = 2 * blk + 2 * blk              # double-buffered input + output blocks
    fp += 2 * 4 * hw_tile * 4           # grid^T tiles (f32), double-buffered
    fp += 2 * 2 * C * 128 * 4           # weight + bias buffers (lane-padded f32)
    if hoisted:
        fp += blk                       # pos scratch (input dtype)
    fp += C * hw_tile * 4               # in-kernel f32 pos temporary
    return fp


# --------------------------------------------------------------------------- #
# Forward wrapper
# --------------------------------------------------------------------------- #
def pos_embeds_forward(x_nchw, grid_param, weight, bias, *, block_budget_bytes=None):
    """x_nchw: (B, C, H, W); grid_param: (1, H, W, 4); weight: (C, 4); bias: (C,)."""
    B, C, H, W = x_nchw.shape
    HW = H * W
    hw_pad = -(-HW // 128) * 128        # round HW up to a multiple of 128

    # Layout glue (free / tiny): NCHW -> (B, C, HW); constants stored lane-major.
    x = x_nchw.reshape(B, C, HW)
    grid_t = jnp.asarray(grid_param, jnp.float32).reshape(HW, 4).T   # (4, HW)
    if hw_pad != HW:
        x = jnp.pad(x, ((0, 0), (0, 0), (0, hw_pad - HW)))
        grid_t = jnp.pad(grid_t, ((0, 0), (0, hw_pad - HW)))
    w = jnp.asarray(weight, jnp.float32)                              # (C, 4)
    b_col = jnp.asarray(bias, jnp.float32).reshape(C, 1)              # (C, 1)

    itemsize = x.dtype.itemsize
    cap = _vmem_capacity_bytes()
    if block_budget_bytes is None:
        # v5e/v6e (128 MiB physical): roomier blocks; v7x (64 MiB): stay at 4 MiB.
        block_budget_bytes = (6 << 20) if cap >= (100 << 20) else (4 << 20)

    hw_tile = _choose_hw_tile(hw_pad, C, itemsize, block_budget_bytes)
    n_hw = hw_pad // hw_tile
    hoisted = n_hw >= 2                 # only hoist pos when both TCs still get HW tiles

    footprint = _estimate_vmem_footprint(C, hw_tile, itemsize, hoisted)
    vmem_limit = int(min(max(32 << 20, footprint + (8 << 20)), int(cap * 0.75)))

    if hoisted:
        grid_dims = (n_hw, B)
        in_specs = [
            pl.BlockSpec((4, hw_tile), lambda j, b: (0, j)),           # grid^T (per-tile)
            pl.BlockSpec((C, 4), lambda j, b: (0, 0)),                 # weight (resident)
            pl.BlockSpec((C, 1), lambda j, b: (0, 0)),                 # bias   (resident)
            pl.BlockSpec((None, C, hw_tile), lambda j, b: (b, 0, j)),  # inputs
        ]
        out_spec = pl.BlockSpec((None, C, hw_tile), lambda j, b: (b, 0, j))
        scratch = [pltpu.VMEM((C, hw_tile), x.dtype)]                  # pos cache
        semantics = ("parallel", "arbitrary")
        kernel = _pos_add_hoisted_kernel
    else:
        grid_dims = (B,)
        in_specs = [
            pl.BlockSpec((4, hw_tile), lambda b: (0, 0)),
            pl.BlockSpec((C, 4), lambda b: (0, 0)),
            pl.BlockSpec((C, 1), lambda b: (0, 0)),
            pl.BlockSpec((None, C, hw_tile), lambda b: (b, 0, 0)),
        ]
        out_spec = pl.BlockSpec((None, C, hw_tile), lambda b: (b, 0, 0))
        scratch = []
        semantics = ("parallel",)
        kernel = _pos_add_simple_kernel

    out = pl.pallas_call(
        kernel,
        out_shape=jax.ShapeDtypeStruct((B, C, hw_pad), x.dtype),
        grid_spec=pltpu.PrefetchScalarGridSpec(
            num_scalar_prefetch=0,
            grid=grid_dims,
            in_specs=in_specs,
            out_specs=out_spec,
            scratch_shapes=scratch,
        ),
        compiler_params=pltpu.CompilerParams(
            dimension_semantics=semantics,
            vmem_limit_bytes=vmem_limit,
        ),
    )(grid_t, w, b_col, x)

    if hw_pad != HW:
        out = out[:, :, :HW]
    return out.reshape(B, C, H, W)


# --------------------------------------------------------------------------- #
# Self-test
# --------------------------------------------------------------------------- #
def _reference(x, grid_param, weight, bias):
    pos = jnp.einsum("bhwf,cf->bhwc", jnp.asarray(grid_param, jnp.float32), weight) + bias
    pos = jnp.moveaxis(pos, 3, 1)                                  # (1, C, H, W)
    return x + pos.astype(x.dtype)


if __name__ == "__main__":
    batch, hidden = 2, 32

    key = jax.random.PRNGKey(0)
    k_x, k_w, k_b, k_x2 = jax.random.split(key, 4)

    # nn.Linear(4, hidden): weight (hidden, 4), bias (hidden,)
    bound = 1.0 / np.sqrt(4.0)
    weight = jax.random.uniform(k_w, (hidden, 4), jnp.float32, -bound, bound)
    bias = jax.random.uniform(k_b, (hidden,), jnp.float32, -bound, bound)

    # --- Case 1: 16x16 resolution, default budget -> single-HW-tile path ----
    res = (16, 16)
    grid_param = jnp.asarray(build_grid(res))                      # (1, H, W, 4)
    x = jax.random.normal(k_x, (batch, hidden, res[0], res[1]), jnp.float32)

    out = pos_embeds_forward(x, grid_param, weight, bias)
    jax.block_until_ready(out)
    np.testing.assert_allclose(np.asarray(out),
                               np.asarray(_reference(x, grid_param, weight, bias)),
                               rtol=1e-5, atol=1e-5)

    # --- Case 2: tiny block budget forces the tiled / hoisted-pos path ------
    out2 = pos_embeds_forward(x, grid_param, weight, bias, block_budget_bytes=16 * 1024)
    jax.block_until_ready(out2)
    np.testing.assert_allclose(np.asarray(out2),
                               np.asarray(_reference(x, grid_param, weight, bias)),
                               rtol=1e-5, atol=1e-5)

    # --- Case 3: non-128-aligned HW exercises the wrapper padding path ------
    res3 = (10, 12)
    grid_param3 = jnp.asarray(build_grid(res3))
    x3 = jax.random.normal(k_x2, (batch, hidden, res3[0], res3[1]), jnp.float32)
    out3 = pos_embeds_forward(x3, grid_param3, weight, bias)
    jax.block_until_ready(out3)
    np.testing.assert_allclose(np.asarray(out3),
                               np.asarray(_reference(x3, grid_param3, weight, bias)),
                               rtol=1e-5, atol=1e-5)

    print("KERNEL_OK")
</pallas_src>

<mosaic_0001>
module attributes {stable_mosaic.version = 11 : i64} {
  func.func @_pos_add_simple_kernel(%arg0: i32, %arg1: memref<4x256xf32, #tpu.memory_space<vmem>>, %arg2: memref<32x4xf32, #tpu.memory_space<vmem>>, %arg3: memref<32x1xf32, #tpu.memory_space<vmem>>, %arg4: memref<1x32x256xf32, #tpu.memory_space<vmem>>, %arg5: memref<1x32x256xf32, #tpu.memory_space<vmem>>) attributes {dimension_semantics = [#tpu.dimension_semantics<parallel>], iteration_bounds = array<i64: 2>, scalar_prefetch = 0 : i64, scratch_operands = 0 : i64, tpu.core_type = #tpu.core_type<tc>, window_params = [{pipeline_mode = #tpu.pipeline_mode<synchronous>, transform_indices = @transform_0, window_bounds = array<i64: 4, 256>}, {pipeline_mode = #tpu.pipeline_mode<synchronous>, transform_indices = @transform_1, window_bounds = array<i64: 32, 4>}, {pipeline_mode = #tpu.pipeline_mode<synchronous>, transform_indices = @transform_2, window_bounds = array<i64: 32, 1>}, {transform_indices = @transform_3, window_bounds = array<i64: 1, 32, 256>}, {transform_indices = @transform_4, window_bounds = array<i64: 1, 32, 256>}]} {
    %c0 = arith.constant 0 : index
    %c0_0 = arith.constant 0 : index
    %0 = vector.load %arg3[%c0, %c0_0] : memref<32x1xf32, #tpu.memory_space<vmem>>, vector<32x1xf32>
    %c0_1 = arith.constant 0 : index
    %c0_2 = arith.constant 0 : index
    %1 = vector.load %arg2[%c0_1, %c0_2] : memref<32x4xf32, #tpu.memory_space<vmem>>, vector<32x1xf32>
    %c0_3 = arith.constant 0 : index
    %c0_4 = arith.constant 0 : index
    %2 = vector.load %arg1[%c0_3, %c0_4] : memref<4x256xf32, #tpu.memory_space<vmem>>, vector<1x256xf32>
    %3 = vector.broadcast %1 : vector<32x1xf32> to vector<32x256xf32>
    %4 = vector.broadcast %2 : vector<1x256xf32> to vector<32x256xf32>
    %5 = arith.mulf %3, %4 : vector<32x256xf32>
    %6 = vector.broadcast %0 : vector<32x1xf32> to vector<32x256xf32>
    %7 = arith.addf %6, %5 : vector<32x256xf32>
    %c0_5 = arith.constant 0 : index
    %c1 = arith.constant 1 : index
    %8 = vector.load %arg2[%c0_5, %c1] : memref<32x4xf32, #tpu.memory_space<vmem>>, vector<32x1xf32>
    %c1_6 = arith.constant 1 : index
    %c0_7 = arith.constant 0 : index
    %9 = vector.load %arg1[%c1_6, %c0_7] : memref<4x256xf32, #tpu.memory_space<vmem>>, vector<1x256xf32>
    %10 = vector.broadcast %8 : vector<32x1xf32> to vector<32x256xf32>
    %11 = vector.broadcast %9 : vector<1x256xf32> to vector<32x256xf32>
    %12 = arith.mulf %10, %11 : vector<32x256xf32>
    %13 = arith.addf %7, %12 : vector<32x256xf32>
    %c0_8 = arith.constant 0 : index
    %c2 = arith.constant 2 : index
    %14 = vector.load %arg2[%c0_8, %c2] : memref<32x4xf32, #tpu.memory_space<vmem>>, vector<32x1xf32>
    %c2_9 = arith.constant 2 : index
    %c0_10 = arith.constant 0 : index
    %15 = vector.load %arg1[%c2_9, %c0_10] : memref<4x256xf32, #tpu.memory_space<vmem>>, vector<1x256xf32>
    %16 = vector.broadcast %14 : vector<32x1xf32> to vector<32x256xf32>
    %17 = vector.broadcast %15 : vector<1x256xf32> to vector<32x256xf32>
    %18 = arith.mulf %16, %17 : vector<32x256xf32>
    %19 = arith.addf %13, %18 : vector<32x256xf32>
    %c0_11 = arith.constant 0 : index
    %c3 = arith.constant 3 : index
    %20 = vector.load %arg2[%c0_11, %c3] : memref<32x4xf32, #tpu.memory_space<vmem>>, vector<32x1xf32>
    %c3_12 = arith.constant 3 : index
    %c0_13 = arith.constant 0 : index
    %21 = vector.load %arg1[%c3_12, %c0_13] : memref<4x256xf32, #tpu.memory_space<vmem>>, vector<1x256xf32>
    %22 = vector.broadcast %20 : vector<32x1xf32> to vector<32x256xf32>
    %23 = vector.broadcast %21 : vector<1x256xf32> to vector<32x256xf32>
    %24 = arith.mulf %22, %23 : vector<32x256xf32>
    %25 = arith.addf %19, %24 : vector<32x256xf32>
    %c0_14 = arith.constant 0 : index
    %c0_15 = arith.constant 0 : index
    %c0_16 = arith.constant 0 : index
    %26 = vector.load %arg4[%c0_14, %c0_15, %c0_16] : memref<1x32x256xf32, #tpu.memory_space<vmem>>, vector<1x32x256xf32>
    %27 = vector.shape_cast %26 : vector<1x32x256xf32> to vector<32x256xf32>
    %28 = arith.addf %27, %25 : vector<32x256xf32>
    %c0_17 = arith.constant 0 : index
    %c0_18 = arith.constant 0 : index
    %c0_19 = arith.constant 0 : index
    %29 = vector.load %arg5[%c0_17, %c0_18, %c0_19] : memref<1x32x256xf32, #tpu.memory_space<vmem>>, vector<1x32x256xf32>
    %30 = vector.shape_cast %29 : vector<1x32x256xf32> to vector<32x256xf32>
    %31 = vector.shape_cast %28 : vector<32x256xf32> to vector<1x32x256xf32>
    tpu.vector_store %arg5[%c0_17, %c0_18, %c0_19], %31 {strides = array<i32>} : memref<1x32x256xf32, #tpu.memory_space<vmem>>, vector<1x32x256xf32>,
    return
  }
  func.func @transform_0(%arg0: i32) -> (i32, i32) {
    %c0_i32 = arith.constant 0 : i32
    %c0_i32_0 = arith.constant 0 : i32
    %c0_i32_1 = arith.constant 0 : i32
    return %c0_i32, %c0_i32_0 : i32, i32
  }
  func.func @transform_1(%arg0: i32) -> (i32, i32) {
    %c0_i32 = arith.constant 0 : i32
    %c0_i32_0 = arith.constant 0 : i32
    %c0_i32_1 = arith.constant 0 : i32
    return %c0_i32, %c0_i32_0 : i32, i32
  }
  func.func @transform_2(%arg0: i32) -> (i32, i32) {
    %c0_i32 = arith.constant 0 : i32
    %c0_i32_0 = arith.constant 0 : i32
    %c0_i32_1 = arith.constant 0 : i32
    return %c0_i32, %c0_i32_0 : i32, i32
  }
  func.func @transform_3(%arg0: i32) -> (i32, i32, i32) {
    %c0_i32 = arith.constant 0 : i32
    %c0_i32_0 = arith.constant 0 : i32
    %c0_i32_1 = arith.constant 0 : i32
    return %arg0, %c0_i32, %c0_i32_0 : i32, i32, i32
  }
  func.func @transform_4(%arg0: i32) -> (i32, i32, i32) {
    %c0_i32 = arith.constant 0 : i32
    %c0_i32_0 = arith.constant 0 : i32
    %c0_i32_1 = arith.constant 0 : i32
    return %arg0, %c0_i32, %c0_i32_0 : i32, i32, i32
  }
}

</mosaic_0001>

<bundles_post_ra>
// kernel: tpu_custom_call.1
= control target key start
LH: loop header
LB: loop body
LE: loop exit
PB: predicated region body
PF: predicated region fallthrough
CT: control target
= control target key end

     0   :  { %9 = vsyncpa [#allocation3], 0  ;;  %s991_s0 = inlined_call_operand.vmem [shape: f32[4,256], index: 0, kind: input, shape index: {}]   ;;  %s992_s1 = inlined_call_operand.vmem [shape: f32[32,4], index: 1, kind: input, shape index: {}]   ;;  %s993_s2 = inlined_call_operand.vmem [shape: f32[32,1], index: 2, kind: input, shape index: {}]   ;;  %s994_s3 = inlined_call_operand.hbm [shape: f32[2,32,256], index: 3, kind: input, shape index: {}]   ;;  %s995_s4 = inlined_call_operand.hbm [shape: f32[2,32,256], index: 4, kind: output, shape index: {}]  }
   0x1   :  { %11 = vsyncpa [#allocation3 + $0x1], 0 }
   0x2   :  { %12 = vsyncpa [#allocation4], 0 }
   0x3   :  { %14 = vsyncpa [#allocation4 + $0x1], 0  ;;  %s748_s15 = smov 0   ;;  %s750_s16 = smov 0  }
   0x4   :  { %s752_s17 = smov 0   ;;  %s754_s18 = smov 0  }
   0x5 LB: > { %s769_s19 = sadd.s32 4294967295, %s711_s18   ;;  %s538_s20 = sadd.s32 4294967294, %s711_s18   ;;  %s711_s18 = sphi %s754_s18, %s1010_s18   ;;  %s707_s17 = sphi %s752_s17, %s1009_s17   ;;  %s703_s16 = sphi %s750_s16, %s1008_s16   ;;  %s699_s15 = sphi %s748_s15, %s1007_s15  }
   0x6   : > { %s773_s21 = sadd.s32 1, %s711_s18   ;;  %s90_s22 = sadd.s32 1, %s707_s17 }
   0x7   : > { %s87_s23 = ssub.s32 %s711_s18, %s773_s21  ;;  %p97_p0 = scmp.ne.s32.totalorder %s707_s17, %s703_s16 }
   0x8   : > { %p88_p1 = scmp.eq.s32.totalorder %s87_s23, 0  ;;  %p98_p2 = scmp.eq.s32.totalorder %s711_s18, 0 }
   0x9   : > { %p103_p3 = scmp.ne.s32.totalorder %s703_s16, %s699_s15  ;;  %p104_p4 = scmp.eq.s32.totalorder %s769_s19, 0 }
   0xa   : > { %s785_s24 = scalar_select %p88_p1, %s707_s17, %s90_s22  }
   0xb   : > { %p787_p5 = por %p98_p2, %p97_p0  ;;  %p791_p6 = por %p104_p4, %p103_p3 }
   0xc   : > { %p127_p7 = scmp.eq.s32.totalorder %s769_s19, 1  ;;  %p133_p8 = scmp.eq.s32.totalorder %s538_s20, 1 }
   0xd   : > { %s999_s26 = scalar_select %p791_p6, 1, 0 }
   0xe   : > { %p569_p10 = scmp.lt.s32.totalorder %s711_s18, 2  ;;  %p798_p11 = por %p127_p7, %p97_p0 }
   0xf   : > { %p802_p12 = por %p133_p8, %p103_p3  ;;  %s162_s29 = sand.u32 1, %s707_s17  }
  0x10   : > { %s1000_s27 = scalar_select %p798_p11, 1, 0 }
  0x11   : > { %s1001_s28 = scalar_select %p802_p12, 1, 0 }
  0x12   : > { %s555_s30 = sshll.u32 %s711_s18, 10  ;;  %s541_s5 = sshll.u32 %s162_s29, 6 }
  0x13   : > { %s811_s8 = scalar_lea.hbm %s994_s3, %s555_s30  ;;  %s166_s9 = scalar_lea.vmem [#allocation2], %s541_s5 }
  0x14   : > { %s173_s10 = sshll.u32 %s166_s9, 4  ;;  %p815_p13 = pnand %p569_p10, %p787_p5  ;;  %s819_s10 = int_to_ptr.vmem [resolvable:$true] %s173_s10 }
  0x15   : > { %s821_s12 = scalar_lea.sflag [#allocation3], %s162_s29  ;;  %s619_s13 = scalar_lea.hbm %s811_s8, 1024 }
  0x16   : > { %p620_p0 = scmp.ne.s32.totalorder %s811_s8, %s619_s13  ;;  %p621_p1 = pneg %p815_p13 }
  0x17   : > { %s624_s22 = scalar_lea.hbm %s994_s3, 2048  ;;  %p625_p4 = scmp.lt.s32.totalorder %s811_s8, %s994_s3 }
  0x18   : > { %p622_p2 = pnand %p621_p1, %p620_p0  ;;  %p626_p5 = scmp.lt.s32.totalorder %s624_s22, %s619_s13 }
  0x1a   : > { %p623_p3 = pneg %p622_p2  ;;  %p627_p7 = por %p626_p5, %p625_p4 }
  0x1c   : > { %p628_p8 = pnand %p627_p7, %p623_p3 }
  0x1e   : > { %631 = shalt.err (!%p628_p8)
}
  0x1f   : > { %s632_s29 = scalar_lea.vmem %s819_s10, 1024  ;;  %s713_s30 = smov [#allocation2]  }
  0x20   : > { %p633_p10 = scmp.ne.s32.totalorder %s819_s10, %s632_s29  ;;  %s637_s5 = sshll.u32 %s713_s30, 4  ;;  %s638_s5 = int_to_ptr.vmem [resolvable:$false] %s637_s5 }
  0x21   : > { %s639_s6 = scalar_lea.vmem %s638_s5, 2048  ;;  %p640_p2 = scmp.lt.s32.totalorder %s819_s10, %s638_s5 }
  0x22   : > { %p635_p9 = pnand %p633_p10, %p621_p1  ;;  %p641_p12 = scmp.lt.s32.totalorder %s639_s6, %s632_s29 }
  0x24   : > { %p636_p0 = pneg %p635_p9  ;;  %p642_p11 = por %p641_p12, %p640_p2 }
  0x26   : > { %p643_p6 = pnand %p642_p11, %p636_p0 }
  0x28   : > { %646 = shalt.err (!%p643_p6)
}
  0x29   : > { %s714_s7 = smov 256   ;;  %s715_s9 = smov 16  }
  0x2a   : > { %564 = dma.hbm_to_vmem [thread:$0]  (!%p815_p13), %s811_s8, 1024, %s819_s10, %s821_s12, %s714_s7, %s714_s7, %s715_s9  }
  0x2b   : > { %p544_p9 = scmp.ge.s32.totalorder %s711_s18, 1  ;;  %p181_p1 = scmp.lt.s32.totalorder %s711_s18, 3 }
  0x2d   : > { %p182_p3 = pnand %p544_p9, %p181_p1 }
  0x2e   : > { %s845_s13 = sand.u32 (!%p182_p3), 1, %s703_s16   ;;  %p1003_p6 = scmp.ne.s32.totalorder (!%p182_p3), %s999_s26, 0 }
  0x2f   : > { %185 = sbr.rel (%p182_p3) target bundleno = 242 (0xf2), region = 36  ;;  %s545_s14 = sshll.u32 (!%p182_p3), %s845_s13, 6 }
  0x30   : > { %s188_s20 = scalar_lea.sflag (!%p182_p3), [#allocation3], %s845_s13  ;;  %s851_s22 = scalar_lea.vmem (!%p182_p3), [#allocation2], %s545_s14 }
  0x34   : > { %690 = dma.done.wait (%p1003_p6), %s188_s20, 1024  }
  0x35   : > { %692 = vsyncadd (%p1003_p6), %s188_s20, 4294966272  ;;  %v716_v0 = vmov 0   ;;  %v222_v1 = vld [vmem:[%s992_s1 + $0x10] sm:$0xff]  ;;  %v220_v2 = vld [vmem:[%s992_s1] sm:$0xff]  ;;  %v717_v9 = vmov 1   ;;  %v718_v10 = vmov 2   ;;  %v246_v18 = vlaneseq }
  0x36   : > { %612 = vset.pattern.permute.xlu1 %v716_v0  ;;  %611 = vset.pattern.permute.xlu0 %v716_v0  ;;  %v223_v3 = vld [vmem:[%s992_s1 + $0x18] sm:$0xff]  ;;  %v221_v4 = vld [vmem:[%s992_s1 + $0x8] sm:$0xff]  ;;  %v216_v6 = vld [vmem:[%s993_s2] sm:$0xff]  ;;  %v719_v11 = vmov 3   ;;  %s919_s6 = scalar_lea.vmem [#allocation5], %s545_s14  ;;  %s556_s14 = sshll.u32 %s769_s19, 10 }
  0x37   : > { %237 = vperm.xlu1 %612, %v222_v1   ;;  %227 = vperm.xlu0 %611, %v220_v2   ;;  %v217_v5 = vld [vmem:[%s993_s2 + $0x8] sm:$0xff]  ;;  %v219_v7 = vld [vmem:[%s993_s2 + $0x18] sm:$0xff]  ;;  %v218_v8 = vld [vmem:[%s993_s2 + $0x10] sm:$0xff]  ;;  %v247_v21 = vshrl.u32 %v246_v18, 7  ;;  %s465_s7 = sshll.u32 %s919_s6, 4  ;;  %s944_s8 = scalar_lea.hbm %s995_s4, %s556_s14  ;;  %s946_s7 = int_to_ptr.vmem [resolvable:$true] %s465_s7 }
  0x38   : > { %v224_v26 = vld [vmem:[%s991_s0] ss:$4 sm:$0x3]  ;;  %v547_v27 = vld [vmem:[%s991_s0 + $0x1] ss:$4 sm:$0x3] }
  0x39   : > { %v248_v24 = vsub.s32 0, %v247_v21  ;;  %v252_v25 = vsub.s32 1, %v247_v21  ;;  %v548_v30 = vld [vmem:[%s991_s0 + $0x2] ss:$4 sm:$0x3]  ;;  %s452_s19 = scalar_lea.sflag [#allocation4], %s845_s13 }
  0x3a   : > { %v549_v39 = vld [vmem:[%s991_s0 + $0x3] ss:$4 sm:$0x3]  ;;  %p1004_p12 = scmp.ne.s32.totalorder %s1000_s27, 0  ;;  %s720_s10 = smov [#allocation5]  }
  0x3b   : > { %242 = vperm.xlu1 %612, %v223_v3   ;;  %232 = vperm.xlu0 %611, %v221_v4   ;;  %v249_v31 = vrot.slane %v224_v26, %v248_v24  ;;  %v253_v32 = vrot.slane %v224_v26, %v252_v25  ;;  %v314_v33 = vrot.slane %v547_v27, %v248_v24  ;;  %s651_s11 = sshll.u32 %s720_s10, 4  ;;  %s652_s11 = int_to_ptr.vmem [resolvable:$false] %s651_s11 }
  0x3c   : > { %v318_v34 = vrot.slane %v547_v27, %v252_v25  ;;  %v892_v37 = vrot.slane %v548_v30, %v248_v24  ;;  %v894_v38 = vrot.slane %v548_v30, %v252_v25  ;;  %v899_v44 = vrot.slane %v549_v39, %v248_v24  ;;  %s653_s12 = scalar_lea.vmem %s652_s11, 2048  ;;  %p654_p5 = scmp.lt.s32.totalorder %s946_s7, %s652_s11 }
  0x3d   : > { %v901_v45 = vrot.slane %v549_v39, %v252_v25 }
  0x3f   : > { %271 = vperm.xlu1 %612, %v217_v5   ;;  %266 = vperm.xlu0 %611, %v216_v6  }
  0x43   : > { %281 = vperm.xlu1 %612, %v219_v7   ;;  %276 = vperm.xlu0 %611, %v218_v8   ;;  %v427_v8 = vld [vmem:[%s851_s22] sm:$0xff] }
  0x47   : > { %614 = vset.pattern.permute.xlu1 %v717_v9  ;;  %613 = vset.pattern.permute.xlu0 %v717_v9  ;;  %v428_v9 = vld [vmem:[%s851_s22 + $0x8] sm:$0xff] }
  0x48   : > { %299 = vperm.xlu1 %614, %v221_v4   ;;  %295 = vperm.xlu0 %613, %v220_v2  }
  0x4c   : > { %303 = vperm.xlu1 %614, %v222_v1   ;;  %307 = vperm.xlu0 %613, %v223_v3  }
  0x50   : > { %615 = vset.pattern.permute.xlu1 %v718_v10  ;;  %616 = vset.pattern.permute.xlu0 %v718_v10 }
  0x51   : > { %340 = vperm.xlu1 %615, %v220_v2   ;;  %344 = vperm.xlu0 %616, %v221_v4  }
  0x55   : > { %348 = vperm.xlu1 %615, %v222_v1   ;;  %617 = vset.pattern.permute.xlu0 %v719_v11 }
  0x56   : > { %385 = vperm.xlu0 %617, %v220_v2  }
  0x59   : > { %352 = vperm.xlu1 %615, %v223_v3  }
  0x5a   : > { %397 = vperm.xlu0 %617, %v223_v3  }
  0x5d   : > { %618 = vset.pattern.permute.xlu1 %v719_v11 }
  0x5e   : > { %389 = vperm.xlu1 %618, %v221_v4  }
  0x62   : > { %393 = vperm.xlu1 %618, %v222_v1  }
  0xb2   : > { %v238_v12 = vpop.permute.xlu1 %237  ;;  %v228_v13 = vpop.permute.xlu0 %227 }
  0xb3   : > { %v256_v35 = vmul.f32 %v249_v31, %v228_v13  ;;  %v257_v36 = vmul.f32 %v253_v32, %v228_v13  ;;  %v260_v59 = vmul.f32 %v249_v31, %v238_v12  ;;  %v261_v60 = vmul.f32 %v253_v32, %v238_v12 }
  0xb6   : > { %v243_v14 = vpop.permute.xlu1 %242  ;;  %v233_v15 = vpop.permute.xlu0 %232 }
  0xb7   : > { %v262_v50 = vmul.f32 %v249_v31, %v243_v14  ;;  %v263_v51 = vmul.f32 %v253_v32, %v243_v14  ;;  %v258_v52 = vmul.f32 %v249_v31, %v233_v15  ;;  %v259_v53 = vmul.f32 %v253_v32, %v233_v15 }
  0xba   : > { %v272_v16 = vpop.permute.xlu1 %271  ;;  %v267_v17 = vpop.permute.xlu0 %266 }
  0xbb   : > { %v284_v46 = vadd.f32 %v267_v17, %v256_v35  ;;  %v285_v47 = vadd.f32 %v267_v17, %v257_v36  ;;  %v286_v4 = vadd.f32 %v272_v16, %v258_v52  ;;  %v287_v5 = vadd.f32 %v272_v16, %v259_v53  ;;  %v433_v36 = vld [vmem:[%s851_s22 + $0x30] sm:$0xff] }
  0xbe   : > { %v282_v19 = vpop.permute.xlu1 %281  ;;  %v881_v20 = vpop.permute.xlu0 %276 }
  0xbf   : > { %v290_v61 = vadd.f32 %v282_v19, %v262_v50  ;;  %v291_v62 = vadd.f32 %v282_v19, %v263_v51  ;;  %v288_v30 = vadd.f32 %v881_v20, %v260_v59  ;;  %v289_v31 = vadd.f32 %v881_v20, %v261_v60  ;;  %v431_v60 = vld [vmem:[%s851_s22 + $0x20] sm:$0xff] }
  0xc3   : > { %v300_v22 = vpop.permute.xlu1 %299  ;;  %v296_v23 = vpop.permute.xlu0 %295 }
  0xc4   : > { %v321_v40 = vmul.f32 %v314_v33, %v296_v23  ;;  %v322_v41 = vmul.f32 %v318_v34, %v296_v23  ;;  %v323_v6 = vmul.f32 %v314_v33, %v300_v22  ;;  %v324_v7 = vmul.f32 %v318_v34, %v300_v22 }
  0xc6   : > { %v329_v54 = vadd.f32 %v321_v40, %v284_v46  ;;  %v330_v55 = vadd.f32 %v322_v41, %v285_v47  ;;  %v331_v32 = vadd.f32 %v323_v6, %v286_v4  ;;  %v332_v35 = vadd.f32 %v324_v7, %v287_v5 }
  0xc7   : > { %v304_v28 = vpop.permute.xlu1 %303  ;;  %v308_v29 = vpop.permute.xlu0 %307 }
  0xc8   : > { %v327_v56 = vmul.f32 %v314_v33, %v308_v29  ;;  %v328_v57 = vmul.f32 %v318_v34, %v308_v29  ;;  %v325_v25 = vmul.f32 %v314_v33, %v304_v28  ;;  %v326_v26 = vmul.f32 %v318_v34, %v304_v28  ;;  %v434_v33 = vld [vmem:[%s851_s22 + $0x38] sm:$0xff] }
  0xca   : > { %v335_v10 = vadd.f32 %v327_v56, %v290_v61  ;;  %v336_v11 = vadd.f32 %v328_v57, %v291_v62  ;;  %v333_v47 = vadd.f32 %v325_v25, %v288_v30  ;;  %v432_v61 = vld [vmem:[%s851_s22 + $0x28] sm:$0xff] }
  0xcc   : > { %v341_v42 = vpop.permute.xlu1 %340  ;;  %v345_v43 = vpop.permute.xlu0 %344 }
  0xcd   : > { %v366_v48 = vmul.f32 %v892_v37, %v341_v42  ;;  %v367_v49 = vmul.f32 %v894_v38, %v341_v42  ;;  %v368_v15 = vmul.f32 %v892_v37, %v345_v43  ;;  %v369_v17 = vmul.f32 %v894_v38, %v345_v43 }
  0xcf   : > { %v374_v0 = vadd.f32 %v366_v48, %v329_v54  ;;  %v375_v1 = vadd.f32 %v367_v49, %v330_v55  ;;  %v376_v41 = vadd.f32 %v368_v15, %v331_v32  ;;  %v377_v42 = vadd.f32 %v369_v17, %v332_v35 }
  0xd0   : > { %v349_v58 = vpop.permute.xlu1 %348  ;;  %v334_v48 = vadd.f32 %v326_v26, %v289_v31 }
  0xd1   : > { %v386_v63 = vpop.permute.xlu0 %385  ;;  %v370_v28 = vmul.f32 %v892_v37, %v349_v58  ;;  %v371_v34 = vmul.f32 %v894_v38, %v349_v58 }
  0xd2   : > { %v411_v2 = vmul.f32 %v899_v44, %v386_v63  ;;  %v412_v3 = vmul.f32 %v901_v45, %v386_v63 }
  0xd3   : > { %v378_v53 = vadd.f32 %v370_v28, %v333_v47  ;;  %v379_v54 = vadd.f32 %v371_v34, %v334_v48 }
  0xd4   : > { %v419_v13 = vadd.f32 %v411_v2, %v374_v0  ;;  %v420_v14 = vadd.f32 %v412_v3, %v375_v1  ;;  %v353_v12 = vpop.permute.xlu1 %352 }
  0xd5   : > { %v372_v18 = vmul.f32 %v892_v37, %v353_v12  ;;  %v373_v19 = vmul.f32 %v894_v38, %v353_v12  ;;  %v398_v21 = vpop.permute.xlu0 %397  ;;  %v429_v37 = vld [vmem:[%s851_s22 + $0x10] sm:$0xff]  ;;  %v430_v38 = vld [vmem:[%s851_s22 + $0x18] sm:$0xff]  ;;  %s647_s22 = scalar_lea.vmem %s946_s7, 1024 }
  0xd6   : > { %v435_v16 = vadd.f32 %v427_v8, %v419_v13  ;;  %v436_v22 = vadd.f32 %v428_v9, %v420_v14  ;;  %v417_v23 = vmul.f32 %v899_v44, %v398_v21  ;;  %v418_v24 = vmul.f32 %v901_v45, %v398_v21  ;;  %p648_p11 = scmp.ne.s32.totalorder %s946_s7, %s647_s22  ;;  %p655_p7 = scmp.lt.s32.totalorder %s653_s12, %s647_s22 }
  0xd7   : > { %v380_v27 = vadd.f32 %v372_v18, %v335_v10  ;;  %v381_v29 = vadd.f32 %v373_v19, %v336_v11 }
  0xd8   : > { %443 = vst [vmem:[%s919_s6] sm:$0xff] %v435_v16  ;;  %444 = vst [vmem:[%s919_s6 + $0x8] sm:$0xff] %v436_v22  ;;  %p649_p13 = pnand %p648_p11, %p1004_p12  ;;  %p656_p8 = por %p655_p7, %p654_p5 }
  0xd9   : > { %v425_v39 = vadd.f32 %v417_v23, %v380_v27  ;;  %v426_v40 = vadd.f32 %v418_v24, %v381_v29  ;;  %v390_v20 = vpop.permute.xlu1 %389 }
  0xda   : > { %v413_v43 = vmul.f32 %v899_v44, %v390_v20  ;;  %v414_v46 = vmul.f32 %v901_v45, %v390_v20  ;;  %p650_p4 = pneg %p649_p13 }
  0xdb   : > { %v441_v49 = vadd.f32 %v433_v36, %v425_v39  ;;  %v442_v50 = vadd.f32 %v434_v33, %v426_v40 }
  0xdc   : > { %v421_v51 = vadd.f32 %v413_v43, %v376_v41  ;;  %v422_v52 = vadd.f32 %v414_v46, %v377_v42  ;;  %p657_p10 = pnand %p656_p8, %p650_p4 }
  0xdd   : > { %449 = vst [vmem:[%s919_s6 + $0x30] sm:$0xff] %v441_v49  ;;  %450 = vst [vmem:[%s919_s6 + $0x38] sm:$0xff] %v442_v50  ;;  %v394_v55 = vpop.permute.xlu1 %393 }
  0xde   : > { %v437_v56 = vadd.f32 %v429_v37, %v421_v51  ;;  %v438_v57 = vadd.f32 %v430_v38, %v422_v52  ;;  %v415_v58 = vmul.f32 %v899_v44, %v394_v55  ;;  %v416_v59 = vmul.f32 %v901_v45, %v394_v55 }
  0xe0   : > { %445 = vst [vmem:[%s919_s6 + $0x10] sm:$0xff] %v437_v56  ;;  %446 = vst [vmem:[%s919_s6 + $0x18] sm:$0xff] %v438_v57  ;;  %v423_v62 = vadd.f32 %v415_v58, %v378_v53  ;;  %v424_v63 = vadd.f32 %v416_v59, %v379_v54 }
  0xe2   : > { %v439_v44 = vadd.f32 %v431_v60, %v423_v62  ;;  %v440_v45 = vadd.f32 %v432_v61, %v424_v63 }
  0xe4   : > { %447 = vst [vmem:[%s919_s6 + $0x20] sm:$0xff] %v439_v44  ;;  %448 = vst [vmem:[%s919_s6 + $0x28] sm:$0xff] %v440_v45 }
  0xe5   : > { %660 = shalt.err (!%p657_p10)
}
  0xe6   : > { %s661_s23 = scalar_lea.hbm %s944_s8, 1024  ;;  %s665_s26 = scalar_lea.hbm %s995_s4, 2048 }
  0xe7   : > { %p662_p0 = scmp.ne.s32.totalorder %s944_s8, %s661_s23  ;;  %p666_p1 = scmp.lt.s32.totalorder %s944_s8, %s995_s4 }
  0xe8   : > { %p667_p3 = scmp.lt.s32.totalorder %s665_s26, %s661_s23 }
  0xe9   : > { %p663_p2 = pnand %p662_p0, %p1004_p12 }
  0xea   : > { %p668_p6 = por %p667_p3, %p666_p1 }
  0xeb   : > { %p664_p9 = pneg %p663_p2 }
  0xed   : > { %p669_p11 = pnand %p668_p6, %p664_p9 }
  0xef   : > { %672 = shalt.err (!%p669_p11)
}
  0xf0   : > { %s721_s6 = smov 256   ;;  %s722_s14 = smov 16  }
  0xf1   : > { %559 = dma.vmem_to_hbm [thread:$0]  (%p1004_p12), %s946_s7, 1024, %s944_s8, %s452_s19, %s721_s6, %s721_s6, %s722_s14  }
  0xf2 PF: > { %s480_s9 = sand.u32 1, %s699_s15   ;;  %p1005_p13 = scmp.ne.s32.totalorder %s1001_s28, 0 }
  0xf3   : > { %p1006_p4 = scmp.ge.s32.totalorder %s711_s18, 2  ;;  %s481_s20 = scalar_lea.sflag [#allocation4], %s480_s9 }
  0xf5   : > { %p566_p5 = pnand %p1006_p4, %p1005_p13 }
  0xf7   : > { %p567_p7 = pneg %p566_p5 }
  0xf9   : > { %694 = dma.done.wait (%p567_p7), %s481_s20, 1024  }
  0xfa   : > { %696 = vsyncadd (%p567_p7), %s481_s20, 4294966272  ;;  %p17_p8 = scmp.ge.s32.totalorder %s773_s21, 4   ;;  %s1007_s15 = smov %s703_s16 }
  0xfb   : > { %s1008_s16 = smov %s707_s17  ;;  %s1009_s17 = smov %s785_s24 }
  0xfc   : > { %s1010_s18 = smov %s773_s21  ;;  %19 = sbr.rel (!%p17_p8) target bundleno = 5 (0x5), region = 84 }
 0x101   :  { %486 = vsyncpa [#allocation3], 1 }
 0x102   :  { %488 = vsyncpa [#allocation3 + $0x1], 1 }
 0x103   :  { %489 = vsyncpa [#allocation4], 1 }
 0x104   :  { %491 = vsyncpa [#allocation4 + $0x1], 1 }

</bundles_post_ra>
